<compile_context>
chip_gen: v5e
topology: v5e:2x2
jax: 0.10.0
libtpu: 0.0.40
codegen_flags: <defaults>
</compile_context>

<pallas_src>
import math
import numpy as np
import jax
import jax.numpy as jnp
from jax.experimental import pallas as pl
from jax.experimental.pallas import tpu as pltpu


_LANE = 128                            # lane width: last block dim multiple of 128 (or full dim)
_MAX_FOLD_ROW_BYTES = 512 * 1024       # cap on folded slab-row size (keeps pe row + tiles modest)
_PER_BUFFER_CAP_BYTES = 8 * 1024 * 1024   # per-buffer tile target (review: 6-8 MiB)
_SMALL_INPUT_BYTES = 1 << 20           # below this, plain jnp beats a pallas_call


def make_positional_encoding(d_model: int, max_len: int = 5000) -> jnp.ndarray:
    """Deterministically build the pe buffer exactly like the PyTorch __init__."""
    position = np.arange(max_len, dtype=np.float32)[:, None]                 # [max_len, 1]
    div_term = np.exp(np.arange(0, d_model, 2, dtype=np.float32)
                      * (-np.log(10000.0) / d_model))                        # [ceil(d/2)]
    pe = np.zeros((max_len, d_model), dtype=np.float32)
    pe[:, 0::2] = np.sin(position * div_term)
    pe[:, 1::2] = np.cos(position * div_term)
    return jnp.asarray(pe)


def _sublane_granule(dtype) -> int:
    """8 rows for 32-bit, 16 for 16-bit, 32 for 8-bit (sub-32-bit packs along sublanes)."""
    itemsize = jnp.dtype(dtype).itemsize
    return max(8, 32 // max(itemsize, 1))


def _chip_vmem_bytes() -> int:
    """Per-TensorCore VMEM capacity; query hardware, fall back by device kind."""
    try:
        v = int(pltpu.get_tpu_info().vmem_capacity_bytes)
        if v > 0:
            return v
    except Exception:
        pass
    try:
        kind = jax.devices()[0].device_kind.lower()
    except Exception:
        kind = ""
    return (64 if "v7" in kind else 128) * 1024 * 1024


def _dimension_semantics():
    """CORE_PARALLEL on multi-TensorCore chips (v7x), plain 'parallel' elsewhere."""
    try:
        kind = jax.devices()[0].device_kind.lower()
    except Exception:
        kind = ""
    if "v7" in kind and hasattr(pltpu, "CORE_PARALLEL"):
        return (pltpu.CORE_PARALLEL,)
    return ("parallel",)


def _pick_tile_rows(rows: int, width: int, itemsize: int, granule: int,
                    per_buf_bytes: int) -> int:
    """Largest legal row-tile within the per-buffer byte budget, preferring exact divisors."""
    if rows <= granule:
        return rows                                    # full array dim -> always legal
    row_bytes = width * itemsize
    cap = max(granule, per_buf_bytes // max(row_bytes, 1))
    cap = min(cap, rows)
    if cap >= rows:
        return rows                                    # whole array in one block
    cap = max(granule, (cap // granule) * granule)
    # Prefer a tile_m that divides rows exactly (no masked tail); don't shrink below half.
    if rows % granule == 0:
        t = cap
        lo = max(granule, cap // 2)
        while t >= lo:
            if rows % t == 0:
                return t
            t -= granule
    return cap


def _pos_enc_kernel(x_ref, pe_ref, o_ref):
    # x_ref: (tile_m, W) tile; pe_ref: (1, W) row, resident across the grid (constant
    # index_map).  Sublane-broadcast add; explicit cast for low-precision dtypes.
    o_ref[...] = (x_ref[...] + pe_ref[...]).astype(o_ref.dtype)


def _run_broadcast_add(x2d: jnp.ndarray, pe_wide: jnp.ndarray,
                       max_tile_bytes: int | None = None) -> jnp.ndarray:
    rows, width = x2d.shape
    itemsize = x2d.dtype.itemsize
    granule = _sublane_granule(x2d.dtype)
    row_bytes = width * itemsize
    pe_bytes = row_bytes

    chip_vmem = _chip_vmem_bytes()
    vmem_limit = (chip_vmem * 3) // 4                  # 48 MiB v7x, 96 MiB v5e/v6e

    # 2x double-buffered slabs (x in + out) + 2x pe buffers + ~2 MiB headroom.
    budget = max(512 * 1024, (vmem_limit - 2 * pe_bytes - (2 << 20)) // 4)
    per_buf = min(_PER_BUFFER_CAP_BYTES, budget)
    if max_tile_bytes is not None:                     # test hook / caller override
        per_buf = min(per_buf, max(int(max_tile_bytes), row_bytes))

    tile_m = _pick_tile_rows(rows, width, itemsize, granule, per_buf)

    # Ensure the declared limit covers what we actually allocate (huge-width edge case).
    need = 4 * tile_m * row_bytes + 2 * pe_bytes + (2 << 20)
    vmem_limit = int(min(chip_vmem, max(vmem_limit, need)))

    grid = (pl.cdiv(rows, tile_m),)
    cost = pl.CostEstimate(
        flops=rows * width,
        transcendentals=0,
        bytes_accessed=(2 * rows * width + width) * itemsize,
    )

    return pl.pallas_call(
        _pos_enc_kernel,
        out_shape=jax.ShapeDtypeStruct((rows, width), x2d.dtype),
        grid_spec=pltpu.PrefetchScalarGridSpec(
            num_scalar_prefetch=0,
            grid=grid,
            in_specs=[
                pl.BlockSpec((tile_m, width), lambda i: (i, 0)),
                pl.BlockSpec((1, width), lambda i: (0, 0)),     # pe row stays resident
            ],
            out_specs=pl.BlockSpec((tile_m, width), lambda i: (i, 0)),
        ),
        input_output_aliases={0: 0},                            # in-place add on x slab
        compiler_params=pltpu.CompilerParams(
            dimension_semantics=_dimension_semantics(),
            vmem_limit_bytes=vmem_limit,
        ),
        cost_estimate=cost,
    )(x2d, pe_wide)


def positional_encoding_forward(x: jnp.ndarray, pe: jnp.ndarray, *,
                                min_pallas_bytes: int = _SMALL_INPUT_BYTES,
                                max_tile_bytes: int | None = None) -> jnp.ndarray:
    """x: [B, S, D].  Returns x + pe[:1, :] broadcast (exact PyTorch forward semantics)."""
    B, S, D = x.shape
    pe_row = pe[0, :].astype(x.dtype)                  # matches `self.pe[:1, :]`
    itemsize = x.dtype.itemsize

    # Tiny inputs: a 1-2 step grid can't pipeline and launch cost exceeds the work.
    if B * S * D * itemsize < min_pallas_bytes:
        return x + pe_row[None, None, :]

    # Preferred path: fold (B,S,D) into (rows, W) with W = lcm(D,128) -> lane-dense,
    # unmasked stores, pe row tiles exactly, zero padding traffic.
    k = _LANE // math.gcd(D, _LANE)                    # D-rows folded per slab row
    width = k * D                                      # lcm(D, 128)
    if (B * S) % k == 0 and width * itemsize <= _MAX_FOLD_ROW_BYTES:
        x2d = x.reshape((B * S) // k, width)
        pe_wide = jnp.tile(pe_row, k).reshape(1, width)
        out2d = _run_broadcast_add(x2d, pe_wide, max_tile_bytes)
        return out2d.reshape(B, S, D)

    # Otherwise: (B*S, D) with a full-extent last dim (legal even when D % 128 != 0);
    # no padded copies, no extra HBM passes (last-dim stores may be masked).
    x2d = x.reshape(B * S, D)
    pe_wide = pe_row.reshape(1, D)
    out2d = _run_broadcast_add(x2d, pe_wide, max_tile_bytes)
    return out2d.reshape(B, S, D)


if __name__ == "__main__":
    key = jax.random.PRNGKey(0)

    # --- case 1: module-sized small input (batch=2, seq=8, d_model=32) ---------------
    d_model, max_len = 32, 64
    B, S = 2, 8
    pe = make_positional_encoding(d_model, max_len)
    x = jax.random.normal(key, (B, S, d_model), dtype=jnp.float32)
    ref = np.asarray(x) + np.asarray(pe)[:1, :][None, :, :]

    # (a) default dispatch: tiny input -> plain-jnp fast path
    out = jax.block_until_ready(positional_encoding_forward(x, pe))
    np.testing.assert_allclose(np.asarray(out), ref, rtol=1e-6, atol=1e-6)

    # (b) force the Pallas kernel on the same shape (lcm-fold path, k=4, single block)
    out = jax.block_until_ready(positional_encoding_forward(x, pe, min_pallas_bytes=0))
    np.testing.assert_allclose(np.asarray(out), ref, rtol=1e-6, atol=1e-6)

    # --- case 2: lcm-fold path with a multi-step grid (tiny tiles forced) -------------
    k2 = jax.random.PRNGKey(1)
    x2 = jax.random.normal(k2, (2, 128, 32), dtype=jnp.float32)
    ref2 = np.asarray(x2) + np.asarray(pe)[:1, :][None, :, :]
    out2 = jax.block_until_ready(
        positional_encoding_forward(x2, pe, min_pallas_bytes=0, max_tile_bytes=4096))
    np.testing.assert_allclose(np.asarray(out2), ref2, rtol=1e-6, atol=1e-6)

    # --- case 3: non-fold path (D=96 full-extent last dim, masked partial tail) -------
    d3 = 96
    pe3 = make_positional_encoding(d3, max_len)
    k3 = jax.random.PRNGKey(2)
    x3 = jax.random.normal(k3, (2, 9, d3), dtype=jnp.float32)   # B*S=18, not divisible by k=4
    ref3 = np.asarray(x3) + np.asarray(pe3)[:1, :][None, :, :]
    out3 = jax.block_until_ready(
        positional_encoding_forward(x3, pe3, min_pallas_bytes=0, max_tile_bytes=3072))
    np.testing.assert_allclose(np.asarray(out3), ref3, rtol=1e-6, atol=1e-6)

    print("KERNEL_OK")
</pallas_src>

<mosaic_0001>
module attributes {stable_mosaic.version = 11 : i64} {
  func.func @_pos_enc_kernel(%arg0: i32, %arg1: memref<4x128xf32, #tpu.memory_space<vmem>>, %arg2: memref<1x128xf32, #tpu.memory_space<vmem>>, %arg3: memref<4x128xf32, #tpu.memory_space<vmem>>) attributes {dimension_semantics = [#tpu.dimension_semantics<parallel>], iteration_bounds = array<i64: 1>, scalar_prefetch = 0 : i64, scratch_operands = 0 : i64, tpu.core_type = #tpu.core_type<tc>, window_params = [{transform_indices = @transform_0, window_bounds = array<i64: 4, 128>}, {pipeline_mode = #tpu.pipeline_mode<synchronous>, transform_indices = @transform_1, window_bounds = array<i64: 1, 128>}, {transform_indices = @transform_2, window_bounds = array<i64: 4, 128>}]} {
    %c0 = arith.constant 0 : index
    %c0_0 = arith.constant 0 : index
    %0 = vector.load %arg1[%c0, %c0_0] : memref<4x128xf32, #tpu.memory_space<vmem>>, vector<4x128xf32>
    %c0_1 = arith.constant 0 : index
    %c0_2 = arith.constant 0 : index
    %1 = vector.load %arg2[%c0_1, %c0_2] : memref<1x128xf32, #tpu.memory_space<vmem>>, vector<1x128xf32>
    %2 = vector.broadcast %1 : vector<1x128xf32> to vector<4x128xf32>
    %3 = arith.addf %0, %2 : vector<4x128xf32>
    %c0_3 = arith.constant 0 : index
    %c0_4 = arith.constant 0 : index
    %4 = vector.load %arg3[%c0_3, %c0_4] : memref<4x128xf32, #tpu.memory_space<vmem>>, vector<4x128xf32>
    tpu.vector_store %arg3[%c0_3, %c0_4], %3 {strides = array<i32>} : memref<4x128xf32, #tpu.memory_space<vmem>>, vector<4x128xf32>,
    return
  }
  func.func @transform_0(%arg0: i32) -> (i32, i32) {
    %c0_i32 = arith.constant 0 : i32
    %c0_i32_0 = arith.constant 0 : i32
    return %arg0, %c0_i32 : i32, i32
  }
  func.func @transform_1(%arg0: i32) -> (i32, i32) {
    %c0_i32 = arith.constant 0 : i32
    %c0_i32_0 = arith.constant 0 : i32
    %c0_i32_1 = arith.constant 0 : i32
    return %c0_i32, %c0_i32_0 : i32, i32
  }
  func.func @transform_2(%arg0: i32) -> (i32, i32) {
    %c0_i32 = arith.constant 0 : i32
    %c0_i32_0 = arith.constant 0 : i32
    return %arg0, %c0_i32 : i32, i32
  }
}

</mosaic_0001>

<bundles_post_ra>
// kernel: tpu_custom_call.1
= control target key start
LH: loop header
LB: loop body
LE: loop exit
PB: predicated region body
PF: predicated region fallthrough
CT: control target
= control target key end

     0   :  { %7 = vsyncpa [#allocation3], 0  ;;  %s131_s0 = inlined_call_operand.hbm [shape: f32[4,128], index: 0, kind: input, shape index: {}, may-alias: {0,2}]   ;;  %s132_s1 = inlined_call_operand.vmem [shape: f32[1,128], index: 1, kind: input, shape index: {}]   ;;  %s133_s2 = inlined_call_operand.hbm [shape: f32[4,128], index: 2, kind: output, shape index: {}, may-alias: {0,2}]  }
   0x1   :  { %8 = vsyncpa [#allocation4], 0  ;;  %s14_s11 = sshll.u32 %s131_s0, 4  ;;  %s105_s12 = smov [#allocation2]   ;;  %s15_s11 = int_to_ptr.hbm [resolvable:$true] %s14_s11 }
   0x2   :  { %s16_s13 = sshll.u32 %s105_s12, 4  ;;  %s17_s13 = int_to_ptr.vmem [resolvable:$true] %s16_s13 }
   0x3   :  { %19 = dma.hbm_to_vmem [thread:$0]  %s15_s11, 64, %s17_s13, [#allocation3]  }
   0x4   :  { %101 = dma.done.wait [#allocation3], 64  }
   0x5   :  { %102 = vsyncadd [#allocation3], 4294967232  ;;  %s106_s14 = smov [#allocation5]   ;;  %s40_s18 = sshll.u32 %s133_s2, 4  ;;  %v26_v0 = vld [vmem:[#allocation2] sm:$0xf]  ;;  %s41_s18 = int_to_ptr.hbm [resolvable:$true] %s40_s18 }
   0x6   :  { %s38_s15 = sshll.u32 %s106_s14, 4  ;;  %v52_v1 = vld [vmem:[%s132_s1] ss:$0 sm:$0xff]  ;;  %s39_s15 = int_to_ptr.vmem [resolvable:$true] %s38_s15 }
   0x7   :  { %v31_v2 = vadd.f32 %v52_v1, %v26_v0 }
   0x9   :  { %32 = vst [vmem:[#allocation5] sm:$0xf] %v31_v2 }
   0xa   :  { %43 = dma.vmem_to_hbm [thread:$0]  %s39_s15, 64, %s41_s18, [#allocation4]  }
   0xb   :  { %103 = dma.done.wait [#allocation4], 64  }
   0xc   :  { %104 = vsyncadd [#allocation4], 4294967232 }
   0xd   :  { %48 = vsyncpa [#allocation3], 1 }
   0xe   :  { %49 = vsyncpa [#allocation4], 1 }

</bundles_post_ra>
